<compile_context>
chip_gen: v7x
topology: tpu7x:2x2x1
jax: 0.10.0
libtpu: 0.0.40
codegen_flags: <defaults>
</compile_context>

<pallas_src>
import functools

import jax
import jax.numpy as jnp
from jax.experimental import pallas as pl
from jax.experimental.pallas import tpu as pltpu


def _mlp_kernel(n_layers, *refs):
    # refs = (x_ref, w0, b0, w1, b1, ..., w_{L-1}, b_{L-1}, out_ref)
    # All weights are block-diagonal packed (G*in, G*out); biases are (1, G*out).
    x_ref = refs[0]
    out_ref = refs[-1]
    params = refs[1:-1]
    assert len(params) == 2 * n_layers

    h = x_ref[...].astype(jnp.float32)                 # (tile_n/G, G*x_dim)
    for i in range(n_layers):
        w = params[2 * i][...]                         # (G*in, G*out), f32 or bf16
        b = params[2 * i + 1][...]                     # (1, G*out), f32
        acc = jnp.dot(h.astype(w.dtype), w,
                      preferred_element_type=jnp.float32)
        h = acc + b
        if i < n_layers - 1:
            h = jnp.maximum(h, 0.0)                    # ReLU (Dropout = identity in eval)
    out_ref[...] = h.astype(out_ref.dtype)             # (tile_n/G, G)


def _default_group():
    """G = 4 on v5e (128x128 MXU passes), G = 8 on v6e/v7x (256x256)."""
    try:
        kind = jax.devices()[0].device_kind.lower()
    except Exception:
        kind = ""
    return 4 if "v5" in kind else 8


def dnn_se_forward(x, weights, biases, theta, *, tile_n=2048, group=None,
                   matmul_dtype=jnp.float32):
    """Pallas forward pass matching DNN_SE.forward (eval mode).

    x:       (N, x_dim) float32
    weights: list of (in, out) float32 arrays (transposed vs PyTorch's (out, in))
    biases:  list of (1, out) float32 arrays
    theta:   (n_splines_a,) float32

    Returns (b, theta) with b of shape (N,), i.e. torch.squeeze(model(x), dim=1).
    """
    n_layers = len(weights)
    assert n_layers >= 1
    assert weights[-1].shape[1] == 1, "last layer must have out_features == 1"
    n, x_dim = x.shape

    G = _default_group() if group is None else int(group)
    row_unit = 8 * G                       # packed-sublane granularity (8 sublanes x G rows)

    # --- pick tile_n: multiple of row_unit, shrunk for small batches, split in
    # two when the whole batch would otherwise be a single grid step (v7x 2 TC).
    tile_n = max(row_unit, (int(tile_n) // row_unit) * row_unit)
    needed = pl.cdiv(n, row_unit) * row_unit
    if needed <= tile_n:
        half = pl.cdiv(needed, 2 * row_unit) * row_unit
        tile_n = max(row_unit, half)
    num_tiles = pl.cdiv(n, tile_n)
    n_pad = num_tiles * tile_n

    # --- pad + batch-pack x: row j*G+g of x lands in packed row j, slot g.
    if n_pad != n:
        x = jnp.pad(x, ((0, n_pad - n), (0, 0)))
    x_packed = x.reshape(n_pad // G, G * x_dim)        # free row-major reshape

    # --- block-diagonal weights / G-tiled biases (built once at trace time).
    eye_g = jnp.eye(G, dtype=jnp.float32)
    flat_params = []
    for w, b in zip(weights, biases):
        w_blk = jnp.kron(eye_g, w.astype(jnp.float32)).astype(matmul_dtype)  # (G*in, G*out)
        b_blk = jnp.tile(b.reshape(1, -1).astype(jnp.float32), (1, G))       # (1, G*out)
        flat_params.append(w_blk)
        flat_params.append(b_blk)

    in_specs = [pl.BlockSpec((tile_n // G, G * x_dim), lambda i: (i, 0))]
    for p in flat_params:
        # Full-shape block + constant index_map: fetched once, VMEM-resident.
        in_specs.append(pl.BlockSpec(p.shape, lambda i: (0, 0)))

    out = pl.pallas_call(
        functools.partial(_mlp_kernel, n_layers),
        out_shape=jax.ShapeDtypeStruct((n_pad // G, G), jnp.float32),
        grid=(num_tiles,),
        in_specs=in_specs,
        out_specs=pl.BlockSpec((tile_n // G, G), lambda i: (i, 0)),
        compiler_params=pltpu.CompilerParams(
            dimension_semantics=("parallel",)),
    )(x_packed, *flat_params)

    b_out = out.reshape(-1)[:n]            # row-major flatten restores row order
    return b_out, theta


def init_params(key, x_dim, n_hidden, n_neurons, n_splines_a):
    """Deterministic parameter init (shapes match the nn.Linear layers)."""
    dims = [x_dim] + [n_neurons] * n_hidden + [1]
    weights, biases = [], []
    for i in range(len(dims) - 1):
        key, wk, bk = jax.random.split(key, 3)
        fan_in, fan_out = dims[i], dims[i + 1]
        bound = 1.0 / jnp.sqrt(jnp.float32(fan_in))
        # stored as (in, out) == transpose of PyTorch's (out, in)
        w = jax.random.uniform(wk, (fan_in, fan_out), jnp.float32, -bound, bound)
        b = jax.random.uniform(bk, (1, fan_out), jnp.float32, -bound, bound)
        weights.append(w)
        biases.append(b)
    theta = jnp.zeros((n_splines_a,), jnp.float32)  # nn.Parameter(torch.zeros(...))
    return weights, biases, theta


def _reference_forward(x, weights, biases, theta):
    h = x
    for i, (w, b) in enumerate(zip(weights, biases)):
        h = h @ w + b
        if i < len(weights) - 1:
            h = jnp.maximum(h, 0.0)
    return jnp.squeeze(h, axis=1), theta


if __name__ == "__main__":
    # Small config consistent with the module's __init__ signature.
    x_dim, n_hidden, n_neurons, p_dropout, n_splines_a = 16, 3, 32, 0.1, 4

    key = jax.random.PRNGKey(0)
    weights, biases, theta = init_params(key, x_dim, n_hidden, n_neurons, n_splines_a)

    # --- small batch (single packed grid tile) ---
    batch = 8
    key, xk = jax.random.split(key)
    x = jax.random.normal(xk, (batch, x_dim), jnp.float32)

    b_out, theta_out = dnn_se_forward(x, weights, biases, theta)
    b_out = jax.block_until_ready(b_out)
    theta_out = jax.block_until_ready(theta_out)

    b_ref, _ = _reference_forward(x, weights, biases, theta)
    assert b_out.shape == (batch,)
    assert theta_out.shape == (n_splines_a,)
    assert jnp.allclose(b_out, b_ref, atol=1e-4, rtol=1e-4)

    # --- larger, non-multiple batch (exercises padding + the 2-tile split) ---
    batch2 = 1000
    key, xk2 = jax.random.split(key)
    x2 = jax.random.normal(xk2, (batch2, x_dim), jnp.float32)

    b_out2, _ = dnn_se_forward(x2, weights, biases, theta)
    b_out2 = jax.block_until_ready(b_out2)
    b_ref2, _ = _reference_forward(x2, weights, biases, theta)
    assert b_out2.shape == (batch2,)
    assert jnp.allclose(b_out2, b_ref2, atol=1e-4, rtol=1e-4)

    # --- bf16 matmul-operand path (MXU-native); f32 accumulation, loose tol ---
    b_out3, _ = dnn_se_forward(x2, weights, biases, theta,
                               matmul_dtype=jnp.bfloat16)
    b_out3 = jax.block_until_ready(b_out3)
    assert b_out3.shape == (batch2,)
    assert jnp.max(jnp.abs(b_out3 - b_ref2)) < 0.1

    print("KERNEL_OK")
</pallas_src>

<mosaic_0001>
module attributes {stable_mosaic.version = 11 : i64} {
  func.func @_mlp_kernel(%arg0: i32, %arg1: memref<8x128xf32, #tpu.memory_space<vmem>>, %arg2: memref<128x256xf32, #tpu.memory_space<vmem>>, %arg3: memref<1x256xf32, #tpu.memory_space<vmem>>, %arg4: memref<256x256xf32, #tpu.memory_space<vmem>>, %arg5: memref<1x256xf32, #tpu.memory_space<vmem>>, %arg6: memref<256x256xf32, #tpu.memory_space<vmem>>, %arg7: memref<1x256xf32, #tpu.memory_space<vmem>>, %arg8: memref<256x8xf32, #tpu.memory_space<vmem>>, %arg9: memref<1x8xf32, #tpu.memory_space<vmem>>, %arg10: memref<8x8xf32, #tpu.memory_space<vmem>>) attributes {dimension_semantics = [#tpu.dimension_semantics<parallel>], iteration_bounds = array<i64: 1>, scalar_prefetch = 0 : i64, scratch_operands = 0 : i64, tpu.core_type = #tpu.core_type<tc>, window_params = [{transform_indices = @transform_0, window_bounds = array<i64: 8, 128>}, {pipeline_mode = #tpu.pipeline_mode<synchronous>, transform_indices = @transform_1, window_bounds = array<i64: 128, 256>}, {pipeline_mode = #tpu.pipeline_mode<synchronous>, transform_indices = @transform_2, window_bounds = array<i64: 1, 256>}, {pipeline_mode = #tpu.pipeline_mode<synchronous>, transform_indices = @transform_3, window_bounds = array<i64: 256, 256>}, {pipeline_mode = #tpu.pipeline_mode<synchronous>, transform_indices = @transform_4, window_bounds = array<i64: 1, 256>}, {pipeline_mode = #tpu.pipeline_mode<synchronous>, transform_indices = @transform_5, window_bounds = array<i64: 256, 256>}, {pipeline_mode = #tpu.pipeline_mode<synchronous>, transform_indices = @transform_6, window_bounds = array<i64: 1, 256>}, {pipeline_mode = #tpu.pipeline_mode<synchronous>, transform_indices = @transform_7, window_bounds = array<i64: 256, 8>}, {pipeline_mode = #tpu.pipeline_mode<synchronous>, transform_indices = @transform_8, window_bounds = array<i64: 1, 8>}, {transform_indices = @transform_9, window_bounds = array<i64: 8, 8>}]} {
    %c0 = arith.constant 0 : index
    %c0_0 = arith.constant 0 : index
    %0 = vector.load %arg1[%c0, %c0_0] : memref<8x128xf32, #tpu.memory_space<vmem>>, vector<8x128xf32>
    %c0_1 = arith.constant 0 : index
    %c0_2 = arith.constant 0 : index
    %1 = vector.load %arg2[%c0_1, %c0_2] : memref<128x256xf32, #tpu.memory_space<vmem>>, vector<128x256xf32>
    %c0_3 = arith.constant 0 : index
    %c0_4 = arith.constant 0 : index
    %2 = vector.load %arg3[%c0_3, %c0_4] : memref<1x256xf32, #tpu.memory_space<vmem>>, vector<1x256xf32>
    %cst = arith.constant dense<0.000000e+00> : vector<8x256xf32>
    %3 = tpu.matmul %0, %1, %cst {dimension_numbers = #tpu.dot_dimension_numbers<[1], [0], [0], [1], [0, 0, 1, 1], [], []>} : vector<8x128xf32>, vector<128x256xf32>, vector<8x256xf32> -> vector<8x256xf32>
    %4 = vector.broadcast %2 : vector<1x256xf32> to vector<8x256xf32>
    %5 = arith.addf %3, %4 : vector<8x256xf32>
    %cst_5 = arith.constant 0.000000e+00 : f32
    %6 = vector.broadcast %cst_5 : f32 to vector<8x256xf32>
    %7 = arith.maximumf %5, %6 : vector<8x256xf32>
    %c0_6 = arith.constant 0 : index
    %c0_7 = arith.constant 0 : index
    %8 = vector.load %arg4[%c0_6, %c0_7] : memref<256x256xf32, #tpu.memory_space<vmem>>, vector<256x256xf32>
    %c0_8 = arith.constant 0 : index
    %c0_9 = arith.constant 0 : index
    %9 = vector.load %arg5[%c0_8, %c0_9] : memref<1x256xf32, #tpu.memory_space<vmem>>, vector<1x256xf32>
    %cst_10 = arith.constant dense<0.000000e+00> : vector<8x256xf32>
    %10 = tpu.matmul %7, %8, %cst_10 {dimension_numbers = #tpu.dot_dimension_numbers<[1], [0], [0], [1], [0, 0, 1, 1], [], []>} : vector<8x256xf32>, vector<256x256xf32>, vector<8x256xf32> -> vector<8x256xf32>
    %11 = vector.broadcast %9 : vector<1x256xf32> to vector<8x256xf32>
    %12 = arith.addf %10, %11 : vector<8x256xf32>
    %cst_11 = arith.constant 0.000000e+00 : f32
    %13 = vector.broadcast %cst_11 : f32 to vector<8x256xf32>
    %14 = arith.maximumf %12, %13 : vector<8x256xf32>
    %c0_12 = arith.constant 0 : index
    %c0_13 = arith.constant 0 : index
    %15 = vector.load %arg6[%c0_12, %c0_13] : memref<256x256xf32, #tpu.memory_space<vmem>>, vector<256x256xf32>
    %c0_14 = arith.constant 0 : index
    %c0_15 = arith.constant 0 : index
    %16 = vector.load %arg7[%c0_14, %c0_15] : memref<1x256xf32, #tpu.memory_space<vmem>>, vector<1x256xf32>
    %cst_16 = arith.constant dense<0.000000e+00> : vector<8x256xf32>
    %17 = tpu.matmul %14, %15, %cst_16 {dimension_numbers = #tpu.dot_dimension_numbers<[1], [0], [0], [1], [0, 0, 1, 1], [], []>} : vector<8x256xf32>, vector<256x256xf32>, vector<8x256xf32> -> vector<8x256xf32>
    %18 = vector.broadcast %16 : vector<1x256xf32> to vector<8x256xf32>
    %19 = arith.addf %17, %18 : vector<8x256xf32>
    %cst_17 = arith.constant 0.000000e+00 : f32
    %20 = vector.broadcast %cst_17 : f32 to vector<8x256xf32>
    %21 = arith.maximumf %19, %20 : vector<8x256xf32>
    %c0_18 = arith.constant 0 : index
    %c0_19 = arith.constant 0 : index
    %22 = vector.load %arg8[%c0_18, %c0_19] : memref<256x8xf32, #tpu.memory_space<vmem>>, vector<256x8xf32>
    %c0_20 = arith.constant 0 : index
    %c0_21 = arith.constant 0 : index
    %23 = vector.load %arg9[%c0_20, %c0_21] : memref<1x8xf32, #tpu.memory_space<vmem>>, vector<1x8xf32>
    %cst_22 = arith.constant dense<0.000000e+00> : vector<8x8xf32>
    %24 = tpu.matmul %21, %22, %cst_22 {dimension_numbers = #tpu.dot_dimension_numbers<[1], [0], [0], [1], [0, 0, 1, 1], [], []>} : vector<8x256xf32>, vector<256x8xf32>, vector<8x8xf32> -> vector<8x8xf32>
    %25 = vector.broadcast %23 : vector<1x8xf32> to vector<8x8xf32>
    %26 = arith.addf %24, %25 : vector<8x8xf32>
    %c0_23 = arith.constant 0 : index
    %c0_24 = arith.constant 0 : index
    %27 = vector.load %arg10[%c0_23, %c0_24] : memref<8x8xf32, #tpu.memory_space<vmem>>, vector<8x8xf32>
    tpu.vector_store %arg10[%c0_23, %c0_24], %26 {strides = array<i32>} : memref<8x8xf32, #tpu.memory_space<vmem>>, vector<8x8xf32>,
    return
  }
  func.func @transform_0(%arg0: i32) -> (i32, i32) {
    %c0_i32 = arith.constant 0 : i32
    %c0_i32_0 = arith.constant 0 : i32
    return %arg0, %c0_i32 : i32, i32
  }
  func.func @transform_1(%arg0: i32) -> (i32, i32) {
    %c0_i32 = arith.constant 0 : i32
    %c0_i32_0 = arith.constant 0 : i32
    %c0_i32_1 = arith.constant 0 : i32
    return %c0_i32, %c0_i32_0 : i32, i32
  }
  func.func @transform_2(%arg0: i32) -> (i32, i32) {
    %c0_i32 = arith.constant 0 : i32
    %c0_i32_0 = arith.constant 0 : i32
    %c0_i32_1 = arith.constant 0 : i32
    return %c0_i32, %c0_i32_0 : i32, i32
  }
  func.func @transform_3(%arg0: i32) -> (i32, i32) {
    %c0_i32 = arith.constant 0 : i32
    %c0_i32_0 = arith.constant 0 : i32
    %c0_i32_1 = arith.constant 0 : i32
    return %c0_i32, %c0_i32_0 : i32, i32
  }
  func.func @transform_4(%arg0: i32) -> (i32, i32) {
    %c0_i32 = arith.constant 0 : i32
    %c0_i32_0 = arith.constant 0 : i32
    %c0_i32_1 = arith.constant 0 : i32
    return %c0_i32, %c0_i32_0 : i32, i32
  }
  func.func @transform_5(%arg0: i32) -> (i32, i32) {
    %c0_i32 = arith.constant 0 : i32
    %c0_i32_0 = arith.constant 0 : i32
    %c0_i32_1 = arith.constant 0 : i32
    return %c0_i32, %c0_i32_0 : i32, i32
  }
  func.func @transform_6(%arg0: i32) -> (i32, i32) {
    %c0_i32 = arith.constant 0 : i32
    %c0_i32_0 = arith.constant 0 : i32
    %c0_i32_1 = arith.constant 0 : i32
    return %c0_i32, %c0_i32_0 : i32, i32
  }
  func.func @transform_7(%arg0: i32) -> (i32, i32) {
    %c0_i32 = arith.constant 0 : i32
    %c0_i32_0 = arith.constant 0 : i32
    %c0_i32_1 = arith.constant 0 : i32
    return %c0_i32, %c0_i32_0 : i32, i32
  }
  func.func @transform_8(%arg0: i32) -> (i32, i32) {
    %c0_i32 = arith.constant 0 : i32
    %c0_i32_0 = arith.constant 0 : i32
    %c0_i32_1 = arith.constant 0 : i32
    return %c0_i32, %c0_i32_0 : i32, i32
  }
  func.func @transform_9(%arg0: i32) -> (i32, i32) {
    %c0_i32 = arith.constant 0 : i32
    %c0_i32_0 = arith.constant 0 : i32
    return %arg0, %c0_i32 : i32, i32
  }
}

</mosaic_0001>

<bundles_post_ra>
// kernel: tpu_custom_call.1
= control target key start
LH: loop header
LB: loop body
LE: loop exit
PB: predicated region body
PF: predicated region fallthrough
CT: control target
= control target key end

     0   :  { %14 = vsyncpa [#allocation3], 0  ;;  %s1219_s0 = inlined_call_operand.vmem [shape: f32[8,128], index: 0, kind: input, shape index: {}]   ;;  %s1220_s1 = inlined_call_operand.vmem [shape: f32[128,256], index: 1, kind: input, shape index: {}]   ;;  %s1221_s2 = inlined_call_operand.vmem [shape: f32[1,256], index: 2, kind: input, shape index: {}]   ;;  %s1222_s3 = inlined_call_operand.hbm [shape: f32[256,256], index: 3, kind: input, shape index: {}]   ;;  %s1223_s4 = inlined_call_operand.vmem [shape: f32[1,256], index: 4, kind: input, shape index: {}]   ;;  %s1224_s5 = inlined_call_operand.hbm [shape: f32[256,256], index: 5, kind: input, shape index: {}]   ;;  %s1225_s6 = inlined_call_operand.vmem [shape: f32[1,256], index: 6, kind: input, shape index: {}]   ;;  %s1226_s7 = inlined_call_operand.vmem [shape: f32[256,8], index: 7, kind: input, shape index: {}]   ;;  %s1227_s8 = inlined_call_operand.vmem [shape: f32[1,8], index: 8, kind: input, shape index: {}]   ;;  %s1228_s9 = inlined_call_operand.hbm [shape: f32[8,8], index: 9, kind: output, shape index: {}]  }
   0x1   :  { %15 = vsyncpa [#allocation6], 0 }
   0x2   :  { %16 = vsyncpa [#allocation4], 0  ;;  %s910_s30 = smov [#allocation2]   ;;  %s838_s13 = scalar_lea.hbm %s1222_s3, 8192 }
   0x3   :  { %s28_s10 = sshll.u32 %s910_s30, 4  ;;  %p839_p0 = scmp.ne.s32.totalorder %s1222_s3, %s838_s13  ;;  %s29_s10 = int_to_ptr.vmem [resolvable:$true] %s28_s10 }
   0x4   :  { %p842_p1 = scmp.lt.u32.totalorder %s838_s13, %s1222_s3 }
   0x6   :  { %p844_p2 = pnand %p842_p1, %p839_p0 }
   0x8   :  { %847 = shalt.err (!%p844_p2)
}
   0x9   :  { %s848_s18 = scalar_lea.vmem %s29_s10, 8192  ;;  %p853_p4 = scmp.lt.s32.totalorder %s29_s10, %s29_s10 }
   0xa   :  { %p849_p3 = scmp.ne.s32.totalorder %s29_s10, %s848_s18  ;;  %p854_p5 = scmp.lt.s32.totalorder %s848_s18, %s848_s18 }
   0xc   :  { %p855_p6 = por %p854_p5, %p853_p4 }
   0xe   :  { %p856_p7 = pnand %p855_p6, %p849_p3 }
  0x10   :  { %859 = shalt.err (!%p856_p7)
}
  0x11   :  { %s911_s19 = smov 256   ;;  %s912_s20 = smov 16  }
  0x12   :  { %34 = dma.hbm_to_vmem [thread:$0]  %s1222_s3, 8192, %s29_s10, [#allocation3], %s911_s19, %s911_s19, %s912_s20  }
  0x13   :  { %s913_s23 = smov [#allocation5]   ;;  %s860_s27 = scalar_lea.hbm %s1224_s5, 8192 }
  0x14   :  { %s42_s24 = sshll.u32 %s913_s23, 4  ;;  %p861_p8 = scmp.ne.s32.totalorder %s1224_s5, %s860_s27  ;;  %s43_s24 = int_to_ptr.vmem [resolvable:$true] %s42_s24 }
  0x15   :  { %p864_p9 = scmp.lt.u32.totalorder %s860_s27, %s1224_s5 }
  0x17   :  { %p866_p10 = pnand %p864_p9, %p861_p8 }
  0x19   :  { %869 = shalt.err (!%p866_p10)
}
  0x1a   :  { %s870_s12 = scalar_lea.vmem %s43_s24, 8192  ;;  %p875_p12 = scmp.lt.s32.totalorder %s43_s24, %s43_s24 }
  0x1b   :  { %p871_p11 = scmp.ne.s32.totalorder %s43_s24, %s870_s12  ;;  %p876_p13 = scmp.lt.s32.totalorder %s870_s12, %s870_s12 }
  0x1d   :  { %p877_p0 = por %p876_p13, %p875_p12 }
  0x1f   :  { %p878_p1 = pnand %p877_p0, %p871_p11 }
  0x21   :  { %881 = shalt.err (!%p878_p1)
}
  0x22   :  { %48 = dma.hbm_to_vmem [thread:$0]  %s1224_s5, 8192, %s43_s24, [#allocation6], %s911_s19, %s911_s19, %s912_s20  }
  0x23   :  { %904 = dma.done.wait [#allocation3], 8192  }
  0x24   :  { %905 = vsyncadd [#allocation3], 4294959104 }
  0x25   :  { %906 = dma.done.wait [#allocation6], 8192  }
  0x26   :  { %907 = vsyncadd [#allocation6], 4294959104  ;;  %v914_v0 = vmov 0.0   ;;  %v63_v1 = vld [vmem:[%s1220_s1 + $0x8] sm:$0xff]  ;;  %v65_v2 = vld [vmem:[%s1220_s1 + $0x18] sm:$0xff]  ;;  %s915_s24 = smov [#allocation7]  }
  0x27   :  { %170 = vmatprep.mubr.f32.mxu0 %v914_v0  ;;  %v62_v3 = vld [vmem:[%s1220_s1] sm:$0xff]  ;;  %v640_v4 = vpack.c.bf16 %v65_v2, %v63_v1  ;;  %v64_v5 = vld [vmem:[%s1220_s1 + $0x10] sm:$0xff]  ;;  %v67_v6 = vld [vmem:[%s1220_s1 + $0x28] sm:$0xff]  ;;  %vm586_vm0 = vcmask 64512  }
  0x28   :  { %v69_v7 = vld [vmem:[%s1220_s1 + $0x38] sm:$0xff]  ;;  %v642_v8 = vpack.c.bf16 %v64_v5, %v62_v3  ;;  %v66_v10 = vld [vmem:[%s1220_s1 + $0x20] sm:$0xff]  ;;  %v68_v11 = vld [vmem:[%s1220_s1 + $0x30] sm:$0xff] }
  0x29   :  { %v644_v9 = vpack.c.bf16 %v69_v7, %v67_v6  ;;  %v71_v12 = vld [vmem:[%s1220_s1 + $0x48] sm:$0xff]  ;;  %641 = vmatprep.subr.bf16.mxu0 %v640_v4  ;;  %v73_v13 = vld [vmem:[%s1220_s1 + $0x58] sm:$0xff]  ;;  %v646_v14 = vpack.c.bf16 %v68_v11, %v66_v10  ;;  %v70_v16 = vld [vmem:[%s1220_s1 + $0x40] sm:$0xff] }
  0x2a   :  { %643 = vmatpush1.bf16.msra.mxu0 %v642_v8  ;;  %v648_v15 = vpack.c.bf16 %v73_v13, %v71_v12  ;;  %v72_v17 = vld [vmem:[%s1220_s1 + $0x50] sm:$0xff]  ;;  %v75_v18 = vld [vmem:[%s1220_s1 + $0x68] sm:$0xff]  ;;  %v77_v19 = vld [vmem:[%s1220_s1 + $0x78] sm:$0xff] }
  0x2b   :  { %645 = vmatprep.subr.bf16.mxu0 %v644_v9  ;;  %v650_v20 = vpack.c.bf16 %v72_v17, %v70_v16  ;;  %v652_v21 = vpack.c.bf16 %v77_v19, %v75_v18  ;;  %v74_v22 = vld [vmem:[%s1220_s1 + $0x60] sm:$0xff]  ;;  %v76_v23 = vld [vmem:[%s1220_s1 + $0x70] sm:$0xff]  ;;  %v79_v24 = vld [vmem:[%s1220_s1 + $0x88] sm:$0xff] }
  0x2c   :  { %v81_v25 = vld [vmem:[%s1220_s1 + $0x98] sm:$0xff]  ;;  %v78_v26 = vld [vmem:[%s1220_s1 + $0x80] sm:$0xff]  ;;  %v80_v27 = vld [vmem:[%s1220_s1 + $0x90] sm:$0xff]  ;;  %v654_v31 = vpack.c.bf16 %v76_v23, %v74_v22 }
  0x2d   :  { %v180_v28 = vld [vmem:[#allocation2 + $0x8] sm:$0xff]  ;;  %v182_v29 = vld [vmem:[#allocation2 + $0x18] sm:$0xff]  ;;  %v179_v30 = vld [vmem:[#allocation2] sm:$0xff]  ;;  %v656_v36 = vpack.c.bf16 %v81_v25, %v79_v24  ;;  %v658_v46 = vpack.c.bf16 %v80_v27, %v78_v26 }
  0x2e   :  { %647 = vmatpush1.bf16.msra.mxu0 %v646_v14  ;;  %v672_v32 = vpack.c.bf16 %v182_v29, %v180_v28  ;;  %v181_v33 = vld [vmem:[#allocation2 + $0x10] sm:$0xff]  ;;  %v184_v34 = vld [vmem:[#allocation2 + $0x28] sm:$0xff]  ;;  %v186_v35 = vld [vmem:[#allocation2 + $0x38] sm:$0xff] }
  0x2f   :  { %649 = vmatprep.subr.bf16.mxu0 %v648_v15  ;;  %v674_v37 = vpack.c.bf16 %v181_v33, %v179_v30  ;;  %v676_v38 = vpack.c.bf16 %v186_v35, %v184_v34  ;;  %v183_v39 = vld [vmem:[#allocation2 + $0x20] sm:$0xff]  ;;  %v185_v40 = vld [vmem:[#allocation2 + $0x30] sm:$0xff]  ;;  %v188_v41 = vld [vmem:[#allocation2 + $0x48] sm:$0xff] }
  0x30   :  { %v83_v42 = vld [vmem:[%s1220_s1 + $0xa8] sm:$0xff]  ;;  %v85_v43 = vld [vmem:[%s1220_s1 + $0xb8] sm:$0xff]  ;;  %673 = vmatprep.subr.bf16.mxu1 %v672_v32  ;;  %v678_v45 = vpack.c.bf16 %v185_v40, %v183_v39  ;;  %v82_v47 = vld [vmem:[%s1220_s1 + $0xa0] sm:$0xff] }
  0x31   :  { %v190_v44 = vld [vmem:[#allocation2 + $0x58] sm:$0xff]  ;;  %675 = vmatpush1.bf16.msra.mxu1 %v674_v37  ;;  %v187_v49 = vld [vmem:[#allocation2 + $0x40] sm:$0xff]  ;;  %v189_v50 = vld [vmem:[#allocation2 + $0x50] sm:$0xff]  ;;  %v660_v51 = vpack.c.bf16 %v85_v43, %v83_v42 }
  0x32   :  { %651 = vmatpush1.bf16.msra.mxu0 %v650_v20  ;;  %677 = vmatprep.subr.bf16.mxu1 %v676_v38  ;;  %v680_v48 = vpack.c.bf16 %v190_v44, %v188_v41  ;;  %v84_v52 = vld [vmem:[%s1220_s1 + $0xb0] sm:$0xff]  ;;  %v192_v53 = vld [vmem:[#allocation2 + $0x68] sm:$0xff]  ;;  %v194_v54 = vld [vmem:[#allocation2 + $0x78] sm:$0xff]  ;;  %v682_v57 = vpack.c.bf16 %v189_v50, %v187_v49 }
  0x33   :  { %653 = vmatprep.subr.bf16.mxu0 %v652_v21  ;;  %v87_v55 = vld [vmem:[%s1220_s1 + $0xc8] sm:$0xff]  ;;  %v89_v56 = vld [vmem:[%s1220_s1 + $0xd8] sm:$0xff]  ;;  %v662_v58 = vpack.c.bf16 %v84_v52, %v82_v47  ;;  %v86_v59 = vld [vmem:[%s1220_s1 + $0xc0] sm:$0xff]  ;;  %v684_v60 = vpack.c.bf16 %v194_v54, %v192_v53 }
  0x34   :  { %v191_v61 = vld [vmem:[#allocation2 + $0x60] sm:$0xff]  ;;  %v193_v62 = vld [vmem:[#allocation2 + $0x70] sm:$0xff]  ;;  %v664_v63 = vpack.c.bf16 %v89_v56, %v87_v55  ;;  %v196_v1 = vld [vmem:[#allocation2 + $0x88] sm:$0xff] }
  0x35   :  { %679 = vmatpush1.bf16.msra.mxu1 %v678_v45  ;;  %v88_v0 = vld [vmem:[%s1220_s1 + $0xd0] sm:$0xff]  ;;  %v198_v2 = vld [vmem:[#allocation2 + $0x98] sm:$0xff]  ;;  %v91_v3 = vld [vmem:[%s1220_s1 + $0xe8] sm:$0xff]  ;;  %v686_v5 = vpack.c.bf16 %v193_v62, %v191_v61 }
  0x36   :  { %655 = vmatpush1.bf16.msra.mxu0 %v654_v31  ;;  %681 = vmatprep.subr.bf16.mxu1 %v680_v48  ;;  %v93_v4 = vld [vmem:[%s1220_s1 + $0xf8] sm:$0xff]  ;;  %v666_v6 = vpack.c.bf16 %v88_v0, %v86_v59  ;;  %v90_v7 = vld [vmem:[%s1220_s1 + $0xe0] sm:$0xff]  ;;  %v688_v8 = vpack.c.bf16 %v198_v2, %v196_v1  ;;  %v197_v10 = vld [vmem:[#allocation2 + $0x90] sm:$0xff] }
  0x37   :  { %657 = vmatprep.subr.bf16.mxu0 %v656_v36  ;;  %v195_v9 = vld [vmem:[#allocation2 + $0x80] sm:$0xff]  ;;  %v668_v11 = vpack.c.bf16 %v93_v4, %v91_v3  ;;  %v92_v12 = vld [vmem:[%s1220_s1 + $0xf0] sm:$0xff]  ;;  %v200_v13 = vld [vmem:[#allocation2 + $0xa8] sm:$0xff] }
  0x38   :  { %v202_v14 = vld [vmem:[#allocation2 + $0xb8] sm:$0xff]  ;;  %v690_v15 = vpack.c.bf16 %v197_v10, %v195_v9  ;;  %v670_v16 = vpack.c.bf16 %v92_v12, %v90_v7  ;;  %v199_v18 = vld [vmem:[#allocation2 + $0xa0] sm:$0xff]  ;;  %v201_v19 = vld [vmem:[#allocation2 + $0xb0] sm:$0xff] }
  0x39   :  { %683 = vmatpush1.bf16.msra.mxu1 %v682_v57  ;;  %v692_v17 = vpack.c.bf16 %v202_v14, %v200_v13  ;;  %v204_v20 = vld [vmem:[#allocation2 + $0xc8] sm:$0xff]  ;;  %v206_v21 = vld [vmem:[#allocation2 + $0xd8] sm:$0xff]  ;;  %v694_v22 = vpack.c.bf16 %v201_v19, %v199_v18  ;;  %v61_v23 = vld [vmem:[%s1219_s0] sm:$0xff] }
  0x3a   :  { %659 = vmatpush1.bf16.msra.mxu0 %v658_v46  ;;  %685 = vmatprep.subr.bf16.mxu1 %v684_v60  ;;  %v696_v24 = vpack.c.bf16 %v206_v21, %v204_v20  ;;  %v203_v25 = vld [vmem:[#allocation2 + $0xc0] sm:$0xff]  ;;  %v205_v26 = vld [vmem:[#allocation2 + $0xd0] sm:$0xff]  ;;  %v208_v27 = vld [vmem:[#allocation2 + $0xe8] sm:$0xff] }
  0x3b   :  { %661 = vmatprep.subr.bf16.mxu0 %v660_v51  ;;  %v210_v28 = vld [vmem:[#allocation2 + $0xf8] sm:$0xff]  ;;  %v698_v29 = vpack.c.bf16 %v205_v26, %v203_v25  ;;  %v207_v31 = vld [vmem:[#allocation2 + $0xe0] sm:$0xff]  ;;  %v209_v32 = vld [vmem:[#allocation2 + $0xf0] sm:$0xff] }
  0x3c   :  { %v700_v30 = vpack.c.bf16 %v210_v28, %v208_v27  ;;  %v212_v33 = vld [vmem:[#allocation2 + $0x108] sm:$0xff]  ;;  %v214_v34 = vld [vmem:[#allocation2 + $0x118] sm:$0xff]  ;;  %v702_v35 = vpack.c.bf16 %v209_v32, %v207_v31  ;;  %v211_v37 = vld [vmem:[#allocation2 + $0x100] sm:$0xff] }
  0x3d   :  { %687 = vmatpush1.bf16.msra.mxu1 %v686_v5  ;;  %v704_v36 = vpack.c.bf16 %v214_v34, %v212_v33  ;;  %v213_v38 = vld [vmem:[#allocation2 + $0x110] sm:$0xff]  ;;  %v216_v39 = vld [vmem:[#allocation2 + $0x128] sm:$0xff]  ;;  %v218_v40 = vld [vmem:[#allocation2 + $0x138] sm:$0xff] }
  0x3e   :  { %663 = vmatpush1.bf16.msra.mxu0 %v662_v58  ;;  %689 = vmatprep.subr.bf16.mxu1 %v688_v8  ;;  %v706_v41 = vpack.c.bf16 %v213_v38, %v211_v37  ;;  %v708_v42 = vpack.c.bf16 %v218_v40, %v216_v39  ;;  %v215_v43 = vld [vmem:[#allocation2 + $0x120] sm:$0xff]  ;;  %v217_v44 = vld [vmem:[#allocation2 + $0x130] sm:$0xff]  ;;  %v220_v45 = vld [vmem:[#allocation2 + $0x148] sm:$0xff] }
  0x3f   :  { %665 = vmatprep.subr.bf16.mxu0 %v664_v63  ;;  %v222_v46 = vld [vmem:[#allocation2 + $0x158] sm:$0xff]  ;;  %v710_v47 = vpack.c.bf16 %v217_v44, %v215_v43  ;;  %v219_v49 = vld [vmem:[#allocation2 + $0x140] sm:$0xff]  ;;  %v221_v50 = vld [vmem:[#allocation2 + $0x150] sm:$0xff] }
  0x40   :  { %v712_v48 = vpack.c.bf16 %v222_v46, %v220_v45  ;;  %v224_v51 = vld [vmem:[#allocation2 + $0x168] sm:$0xff]  ;;  %v226_v52 = vld [vmem:[#allocation2 + $0x178] sm:$0xff]  ;;  %v714_v53 = vpack.c.bf16 %v221_v50, %v219_v49  ;;  %v223_v55 = vld [vmem:[#allocation2 + $0x160] sm:$0xff] }
  0x41   :  { %691 = vmatpush1.bf16.msra.mxu1 %v690_v15  ;;  %v716_v54 = vpack.c.bf16 %v226_v52, %v224_v51  ;;  %v225_v56 = vld [vmem:[#allocation2 + $0x170] sm:$0xff]  ;;  %v228_v57 = vld [vmem:[#allocation2 + $0x188] sm:$0xff]  ;;  %v230_v58 = vld [vmem:[#allocation2 + $0x198] sm:$0xff] }
  0x42   :  { %667 = vmatpush1.bf16.msra.mxu0 %v666_v6  ;;  %693 = vmatprep.subr.bf16.mxu1 %v692_v17  ;;  %v718_v59 = vpack.c.bf16 %v225_v56, %v223_v55  ;;  %v720_v60 = vpack.c.bf16 %v230_v58, %v228_v57  ;;  %v227_v61 = vld [vmem:[#allocation2 + $0x180] sm:$0xff]  ;;  %v229_v62 = vld [vmem:[#allocation2 + $0x190] sm:$0xff]  ;;  %v232_v63 = vld [vmem:[#allocation2 + $0x1a8] sm:$0xff] }
  0x43   :  { %669 = vmatprep.subr.bf16.mxu0 %v668_v11  ;;  %v234_v0 = vld [vmem:[#allocation2 + $0x1b8] sm:$0xff]  ;;  %v722_v1 = vpack.c.bf16 %v229_v62, %v227_v61  ;;  %v231_v3 = vld [vmem:[#allocation2 + $0x1a0] sm:$0xff]  ;;  %v233_v4 = vld [vmem:[#allocation2 + $0x1b0] sm:$0xff] }
  0x44   :  { %v724_v2 = vpack.c.bf16 %v234_v0, %v232_v63  ;;  %v236_v5 = vld [vmem:[#allocation2 + $0x1c8] sm:$0xff]  ;;  %v238_v6 = vld [vmem:[#allocation2 + $0x1d8] sm:$0xff]  ;;  %v726_v7 = vpack.c.bf16 %v233_v4, %v231_v3  ;;  %v235_v9 = vld [vmem:[#allocation2 + $0x1c0] sm:$0xff] }
  0x45   :  { %695 = vmatpush1.bf16.msra.mxu1 %v694_v22  ;;  %v728_v8 = vpack.c.bf16 %v238_v6, %v236_v5  ;;  %v237_v10 = vld [vmem:[#allocation2 + $0x1d0] sm:$0xff]  ;;  %v240_v12 = vld [vmem:[#allocation2 + $0x1e8] sm:$0xff]  ;;  %v242_v13 = vld [vmem:[#allocation2 + $0x1f8] sm:$0xff] }
  0x46   :  { %671 = vmatpush1.bf16.msra.mxu0 %v670_v16  ;;  %697 = vmatprep.subr.bf16.mxu1 %v696_v24  ;;  %v730_v11 = vpack.c.bf16 %v237_v10, %v235_v9  ;;  %v732_v14 = vpack.c.bf16 %v242_v13, %v240_v12  ;;  %v239_v15 = vld [vmem:[#allocation2 + $0x1e0] sm:$0xff]  ;;  %v241_v16 = vld [vmem:[#allocation2 + $0x1f0] sm:$0xff]  ;;  %v329_v18 = vld [vmem:[#allocation5 + $0x8] sm:$0xff] }
  0x47   :  { %v734_v17 = vpack.c.bf16 %v241_v16, %v239_v15  ;;  %v331_v19 = vld [vmem:[#allocation5 + $0x18] sm:$0xff]  ;;  %v328_v20 = vld [vmem:[#allocation5] sm:$0xff]  ;;  %v330_v22 = vld [vmem:[#allocation5 + $0x10] sm:$0xff] }
  0x48   :  { %v736_v21 = vpack.c.bf16 %v331_v19, %v329_v18  ;;  %v335_v24 = vld [vmem:[#allocation5 + $0x38] sm:$0xff]  ;;  %v738_v25 = vpack.c.bf16 %v330_v22, %v328_v20  ;;  %v332_v27 = vld [vmem:[#allocation5 + $0x20] sm:$0xff]  ;;  %v334_v28 = vld [vmem:[#allocation5 + $0x30] sm:$0xff] }
  0x49   :  { %171 = vmatmul.mubr.f32.vlgmr.msra.gmra.mrb[0].mxu0 %v61_v23  ;;  %699 = vmatpush1.bf16.msra.mxu1 %v698_v29  ;;  %v333_v23 = vld [vmem:[#allocation5 + $0x28] sm:$0xff]  ;;  %v742_v31 = vpack.c.bf16 %v334_v28, %v332_v27  ;;  %v336_v33 = vld [vmem:[#allocation5 + $0x40] sm:$0xff]  ;;  %v338_v34 = vld [vmem:[#allocation5 + $0x50] sm:$0xff] }
  0x4a   :  { %701 = vmatprep.subr.bf16.mxu1 %v700_v30  ;;  %v740_v26 = vpack.c.bf16 %v335_v24, %v333_v23  ;;  %v337_v29 = vld [vmem:[#allocation5 + $0x48] sm:$0xff]  ;;  %737 = vmatprep.subr.bf16.mxu0 %v736_v21  ;;  %v339_v30 = vld [vmem:[#allocation5 + $0x58] sm:$0xff]  ;;  %v746_v37 = vpack.c.bf16 %v338_v34, %v336_v33  ;;  %v340_v39 = vld [vmem:[#allocation5 + $0x60] sm:$0xff] }
  0x4b   :  { %739 = vmatpush1.bf16.msra.mxu0 %v738_v25  ;;  %v744_v32 = vpack.c.bf16 %v339_v30, %v337_v29  ;;  %v342_v40 = vld [vmem:[#allocation5 + $0x70] sm:$0xff]  ;;  %v344_v45 = vld [vmem:[#allocation5 + $0x80] sm:$0xff]  ;;  %v369_v13 = vld [vmem:[#allocation5 + $0x148] sm:$0xff] }
  0x4c   :  { %741 = vmatprep.subr.bf16.mxu0 %v740_v26  ;;  %v750_v43 = vpack.c.bf16 %v342_v40, %v340_v39  ;;  %v346_v46 = vld [vmem:[#allocation5 + $0x90] sm:$0xff]  ;;  %v348_v51 = vld [vmem:[#allocation5 + $0xa0] sm:$0xff]  ;;  %v373_v19 = vld [vmem:[#allocation5 + $0x168] sm:$0xff] }
  0x4d   :  { %703 = vmatpush1.bf16.msra.mxu1 %v702_v35  ;;  %v341_v35 = vld [vmem:[#allocation5 + $0x68] sm:$0xff]  ;;  %v754_v49 = vpack.c.bf16 %v346_v46, %v344_v45  ;;  %v350_v52 = vld [vmem:[#allocation5 + $0xb0] sm:$0xff]  ;;  %v352_v57 = vld [vmem:[#allocation5 + $0xc0] sm:$0xff] }
  0x4e   :  { %705 = vmatprep.subr.bf16.mxu1 %v704_v36  ;;  %v343_v36 = vld [vmem:[#allocation5 + $0x78] sm:$0xff]  ;;  %v758_v55 = vpack.c.bf16 %v350_v52, %v348_v51  ;;  %v354_v58 = vld [vmem:[#allocation5 + $0xd0] sm:$0xff]  ;;  %v356_v63 = vld [vmem:[#allocation5 + $0xe0] sm:$0xff] }
  0x4f   :  { %743 = vmatpush1.bf16.msra.mxu0 %v742_v31  ;;  %v748_v38 = vpack.c.bf16 %v343_v36, %v341_v35  ;;  %v762_v61 = vpack.c.bf16 %v354_v58, %v352_v57  ;;  %v358_v0 = vld [vmem:[#allocation5 + $0xf0] sm:$0xff]  ;;  %v360_v5 = vld [vmem:[#allocation5 + $0x100] sm:$0xff]  ;;  %v375_v20 = vld [vmem:[#allocation5 + $0x178] sm:$0xff] }
  0x50   :  { %745 = vmatprep.subr.bf16.mxu0 %v744_v32  ;;  %v766_v3 = vpack.c.bf16 %v358_v0, %v356_v63  ;;  %v362_v6 = vld [vmem:[#allocation5 + $0x110] sm:$0xff]  ;;  %v780_v22 = vpack.c.bf16 %v375_v20, %v373_v19  ;;  %v372_v23 = vld [vmem:[#allocation5 + $0x160] sm:$0xff]  ;;  %v377_v25 = vld [vmem:[#allocation5 + $0x188] sm:$0xff] }
  0x51   :  { %707 = vmatpush1.bf16.msra.mxu1 %v706_v41  ;;  %v345_v41 = vld [vmem:[#allocation5 + $0x88] sm:$0xff]  ;;  %v770_v9 = vpack.c.bf16 %v362_v6, %v360_v5  ;;  %v366_v12 = vld [vmem:[#allocation5 + $0x130] sm:$0xff]  ;;  %v379_v26 = vld [vmem:[#allocation5 + $0x198] sm:$0xff] }
  0x52   :  { %709 = vmatprep.subr.bf16.mxu1 %v708_v42  ;;  %v347_v42 = vld [vmem:[#allocation5 + $0x98] sm:$0xff]  ;;  %v370_v18 = vld [vmem:[#allocation5 + $0x150] sm:$0xff]  ;;  %v784_v28 = vpack.c.bf16 %v379_v26, %v377_v25  ;;  %v376_v29 = vld [vmem:[#allocation5 + $0x180] sm:$0xff] }
  0x53   :  { %747 = vmatpush1.bf16.msra.mxu0 %v746_v37  ;;  %v752_v44 = vpack.c.bf16 %v347_v42, %v345_v41  ;;  %v374_v24 = vld [vmem:[#allocation5 + $0x170] sm:$0xff]  ;;  %v381_v31 = vld [vmem:[#allocation5 + $0x1a8] sm:$0xff]  ;;  %v383_v32 = vld [vmem:[#allocation5 + $0x1b8] sm:$0xff]  ;;  %v96_v41 = vlaneseq }
  0x54   :  { %749 = vmatprep.subr.bf16.mxu0 %v748_v38  ;;  %v782_v27 = vpack.c.bf16 %v374_v24, %v372_v23  ;;  %v378_v30 = vld [vmem:[#allocation5 + $0x190] sm:$0xff]  ;;  %v788_v34 = vpack.c.bf16 %v383_v32, %v381_v31  ;;  %v380_v35 = vld [vmem:[#allocation5 + $0x1a0] sm:$0xff]  ;;  %v385_v37 = vld [vmem:[#allocation5 + $0x1c8] sm:$0xff] }
  0x55   :  { %711 = vmatpush1.bf16.msra.mxu1 %v710_v47  ;;  %v349_v47 = vld [vmem:[#allocation5 + $0xa8] sm:$0xff]  ;;  %v786_v33 = vpack.c.bf16 %v378_v30, %v376_v29  ;;  %v382_v36 = vld [vmem:[#allocation5 + $0x1b0] sm:$0xff]  ;;  %v387_v38 = vld [vmem:[#allocation5 + $0x1d8] sm:$0xff]  ;;  %v97_v42 = vshrl.u32 %v96_v41, 7 }
  0x56   :  { %713 = vmatprep.subr.bf16.mxu1 %v712_v48  ;;  %v351_v48 = vld [vmem:[#allocation5 + $0xb8] sm:$0xff]  ;;  %v790_v39 = vpack.c.bf16 %v382_v36, %v380_v35  ;;  %v792_v40 = vpack.c.bf16 %v387_v38, %v385_v37  ;;  %v389_v57 = vld [vmem:[#allocation5 + $0x1e8] sm:$0xff]  ;;  %v493_v63 = vld [vmem:[%s1226_s7 + $0x80] sm:$0xff] }
  0x57   :  { %751 = vmatpush1.bf16.msra.mxu0 %v750_v43  ;;  %v756_v50 = vpack.c.bf16 %v351_v48, %v349_v47  ;;  %v1089_v43 = vsub.s32 0, %v97_v42  ;;  %v1094_v45 = vsub.s32 1, %v97_v42  ;;  %v391_v58 = vld [vmem:[#allocation5 + $0x1f8] sm:$0xff]  ;;  %v494_v0 = vld [vmem:[%s1226_s7 + $0x88] sm:$0xff]  ;;  %v483_v20 = vld [vmem:[%s1226_s7 + $0x30] sm:$0xff] }
  0x58   :  { %753 = vmatprep.subr.bf16.mxu0 %v752_v44  ;;  %v94_v44 = vld [vmem:[%s1221_s2] sm:$0x3]  ;;  %v496_v5 = vld [vmem:[%s1226_s7 + $0x98] sm:$0xff]  ;;  %v502_v23 = vld [vmem:[%s1226_s7 + $0xc8] sm:$0xff] }
  0x59   :  { %715 = vmatpush1.bf16.msra.mxu1 %v714_v53  ;;  %v353_v53 = vld [vmem:[#allocation5 + $0xc8] sm:$0xff]  ;;  %v99_v46 = vrot.slane %v94_v44, %v1089_v43  ;;  %v103_v47 = vrot.slane %v94_v44, %v1094_v45  ;;  %v485_v26 = vld [vmem:[%s1226_s7 + $0x40] sm:$0xff]  ;;  %v504_v29 = vld [vmem:[%s1226_s7 + $0xd8] sm:$0xff] }
  0x5a   :  { %717 = vmatprep.subr.bf16.mxu1 %v716_v54  ;;  %v355_v54 = vld [vmem:[#allocation5 + $0xd8] sm:$0xff]  ;;  %v487_v32 = vld [vmem:[%s1226_s7 + $0x50] sm:$0xff]  ;;  %v506_v35 = vld [vmem:[%s1226_s7 + $0xe8] sm:$0xff] }
  0x5b   :  { %755 = vmatpush1.bf16.msra.mxu0 %v754_v49  ;;  %v760_v56 = vpack.c.bf16 %v355_v54, %v353_v53  ;;  %v384_v54 = vld [vmem:[#allocation5 + $0x1c0] sm:$0xff] }
  0x5c   :  { %757 = vmatprep.subr.bf16.mxu0 %v756_v50  ;;  %v243_v38 = vld [vmem:[%s1223_s4] sm:$0x3] }
  0x5d   :  { %719 = vmatpush1.bf16.msra.mxu1 %v718_v59  ;;  %v357_v59 = vld [vmem:[#allocation5 + $0xe8] sm:$0xff] }
  0x5e   :  { %721 = vmatprep.subr.bf16.mxu1 %v720_v60  ;;  %v359_v60 = vld [vmem:[#allocation5 + $0xf8] sm:$0xff] }
  0x5f   :  { %759 = vmatpush1.bf16.msra.mxu0 %v758_v55  ;;  %v764_v62 = vpack.c.bf16 %v359_v60, %v357_v59  ;;  %v386_v55 = vld [vmem:[#allocation5 + $0x1d0] sm:$0xff]  ;;  %v796_v59 = vpack.c.bf16 %v391_v58, %v389_v57  ;;  %v388_v60 = vld [vmem:[#allocation5 + $0x1e0] sm:$0xff] }
  0x60   :  { %761 = vmatprep.subr.bf16.mxu0 %v760_v56  ;;  %v794_v56 = vpack.c.bf16 %v386_v55, %v384_v54  ;;  %v491_v55 = vld [vmem:[%s1226_s7 + $0x70] sm:$0xff]  ;;  %v392_v58 = vld [vmem:[%s1225_s6] sm:$0x3]  ;;  %s594_s6 = sshll.u32 %s915_s24, 4  ;;  %s595_s6 = int_to_ptr.vmem [resolvable:$true] %s594_s6 }
  0x61   :  { %723 = vmatpush1.bf16.msra.mxu1 %v722_v1  ;;  %v361_v1 = vld [vmem:[#allocation5 + $0x108] sm:$0xff]  ;;  %s882_s25 = scalar_lea.vmem %s595_s6, 128  ;;  %p887_p3 = scmp.lt.s32.totalorder %s595_s6, %s595_s6 }
  0x62   :  { %725 = vmatprep.subr.bf16.mxu1 %v724_v2  ;;  %v363_v2 = vld [vmem:[#allocation5 + $0x118] sm:$0xff]  ;;  %p883_p2 = scmp.ne.s32.totalorder %s595_s6, %s882_s25  ;;  %p888_p4 = scmp.lt.s32.totalorder %s882_s25, %s882_s25 }
  0x63   :  { %763 = vmatpush1.bf16.msra.mxu0 %v762_v61  ;;  %v768_v4 = vpack.c.bf16 %v363_v2, %v361_v1  ;;  %v390_v61 = vld [vmem:[#allocation5 + $0x1f0] sm:$0xff]  ;;  %v477_v1 = vld [vmem:[%s1226_s7] sm:$0xff]  ;;  %v800_v2 = vpack.c.bf16 %v494_v0, %v493_v63 }
  0x64   :  { %765 = vmatprep.subr.bf16.mxu0 %v764_v62  ;;  %v798_v62 = vpack.c.bf16 %v390_v61, %v388_v60  ;;  %v401_v60 = vrot.slane %v392_v58, %v1094_v45  ;;  %p889_p5 = por %p888_p4, %p887_p3 }
  0x65   :  { %727 = vmatpush1.bf16.msra.mxu1 %v726_v7  ;;  %v365_v7 = vld [vmem:[#allocation5 + $0x128] sm:$0xff] }
  0x66   :  { %729 = vmatprep.subr.bf16.mxu1 %v728_v8  ;;  %v367_v8 = vld [vmem:[#allocation5 + $0x138] sm:$0xff]  ;;  %p890_p6 = pnand %p889_p5, %p883_p2 }
  0x67   :  { %767 = vmatpush1.bf16.msra.mxu0 %v766_v3  ;;  %v772_v10 = vpack.c.bf16 %v367_v8, %v365_v7  ;;  %v478_v3 = vld [vmem:[%s1226_s7 + $0x8] sm:$0xff]  ;;  %v479_v8 = vld [vmem:[%s1226_s7 + $0x10] sm:$0xff] }
  0x68   :  { %769 = vmatprep.subr.bf16.mxu0 %v768_v4  ;;  %v495_v4 = vld [vmem:[%s1226_s7 + $0x90] sm:$0xff]  ;;  %v802_v6 = vpack.c.bf16 %v478_v3, %v477_v1 }
  0x69   :  { %731 = vmatpush1.bf16.msra.mxu1 %v730_v11  ;;  %v364_v11 = vld [vmem:[#allocation5 + $0x120] sm:$0xff]  ;;  %v804_v7 = vpack.c.bf16 %v496_v5, %v495_v4 }
  0x6a   :  { %733 = vmatprep.subr.bf16.mxu1 %v732_v14  ;;  %v371_v14 = vld [vmem:[#allocation5 + $0x158] sm:$0xff]  ;;  %v774_v15 = vpack.c.bf16 %v366_v12, %v364_v11  ;;  %v498_v11 = vld [vmem:[%s1226_s7 + $0xa8] sm:$0xff]  ;;  %v604_v4 = vld [vmem:[%s1227_s8] ss:$0 sm:$0xff] }
  0x6b   :  { %771 = vmatpush1.bf16.msra.mxu0 %v770_v9  ;;  %v776_v16 = vpack.c.bf16 %v371_v14, %v369_v13  ;;  %v480_v9 = vld [vmem:[%s1226_s7 + $0x18] sm:$0xff]  ;;  %v481_v14 = vld [vmem:[%s1226_s7 + $0x20] sm:$0xff] }
  0x6c   :  { %773 = vmatprep.subr.bf16.mxu0 %v772_v10  ;;  %v497_v10 = vld [vmem:[%s1226_s7 + $0xa0] sm:$0xff]  ;;  %v806_v12 = vpack.c.bf16 %v480_v9, %v479_v8 }
  0x6d   :  { %735 = vmatpush1.bf16.msra.mxu1 %v734_v17  ;;  %v368_v17 = vld [vmem:[#allocation5 + $0x140] sm:$0xff]  ;;  %v808_v13 = vpack.c.bf16 %v498_v11, %v497_v10 }
  0x6e   :  { %v778_v21 = vpack.c.bf16 %v370_v18, %v368_v17  ;;  %801 = vmatprep.subr.bf16.mxu1 %v800_v2  ;;  %v500_v17 = vld [vmem:[%s1226_s7 + $0xb8] sm:$0xff] }
  0x6f   :  { %775 = vmatpush1.bf16.msra.mxu0 %v774_v15  ;;  %v482_v15 = vld [vmem:[%s1226_s7 + $0x28] sm:$0xff] }
  0x70   :  { %777 = vmatprep.subr.bf16.mxu0 %v776_v16  ;;  %v499_v16 = vld [vmem:[%s1226_s7 + $0xb0] sm:$0xff]  ;;  %v810_v18 = vpack.c.bf16 %v482_v15, %v481_v14 }
  0x71   :  { %v812_v19 = vpack.c.bf16 %v500_v17, %v499_v16 }
  0x73   :  { %779 = vmatpush1.bf16.msra.mxu0 %v778_v21  ;;  %v484_v21 = vld [vmem:[%s1226_s7 + $0x38] sm:$0xff] }
  0x74   :  { %781 = vmatprep.subr.bf16.mxu0 %v780_v22  ;;  %v501_v22 = vld [vmem:[%s1226_s7 + $0xc0] sm:$0xff]  ;;  %v814_v24 = vpack.c.bf16 %v484_v21, %v483_v20 }
  0x75   :  { %v816_v25 = vpack.c.bf16 %v502_v23, %v501_v22 }
  0x77   :  { %783 = vmatpush1.bf16.msra.mxu0 %v782_v27  ;;  %v486_v27 = vld [vmem:[%s1226_s7 + $0x48] sm:$0xff] }
  0x78   :  { %785 = vmatprep.subr.bf16.mxu0 %v784_v28  ;;  %v503_v28 = vld [vmem:[%s1226_s7 + $0xd0] sm:$0xff]  ;;  %v818_v30 = vpack.c.bf16 %v486_v27, %v485_v26 }
  0x79   :  { %v820_v31 = vpack.c.bf16 %v504_v29, %v503_v28 }
  0x7b   :  { %787 = vmatpush1.bf16.msra.mxu0 %v786_v33  ;;  %v488_v33 = vld [vmem:[%s1226_s7 + $0x58] sm:$0xff] }
  0x7c   :  { %789 = vmatprep.subr.bf16.mxu0 %v788_v34  ;;  %v505_v34 = vld [vmem:[%s1226_s7 + $0xe0] sm:$0xff]  ;;  %v822_v36 = vpack.c.bf16 %v488_v33, %v487_v32 }
  0x7d   :  { %v824_v37 = vpack.c.bf16 %v506_v35, %v505_v34 }
  0x7f   :  { %791 = vmatpush1.bf16.msra.mxu0 %v790_v39  ;;  %v248_v39 = vrot.slane %v243_v38, %v1089_v43 }
  0x80   :  { %793 = vmatprep.subr.bf16.mxu0 %v792_v40  ;;  %v252_v40 = vrot.slane %v243_v38, %v1094_v45 }
  0x83   :  { %795 = vmatpush1.bf16.msra.mxu0 %v794_v56  ;;  %v492_v56 = vld [vmem:[%s1226_s7 + $0x78] sm:$0xff] }
  0x84   :  { %797 = vmatprep.subr.bf16.mxu0 %v796_v59  ;;  %v830_v57 = vpack.c.bf16 %v492_v56, %v491_v55  ;;  %v397_v59 = vrot.slane %v392_v58, %v1089_v43 }
  0x87   :  { %799 = vmatpush1.bf16.msra.mxu0 %v798_v62 }
 0x11c   :  { %v172_v48 = vpop.f32.mrb[0].mxu0 }
 0x11d   :  { %v173_v49 = vadd.f32 %v172_v48, %v99_v46  ;;  %v174_v50 = vpop.f32.mrb[1].mxu0 }
 0x11e   :  { %v175_v51 = vadd.f32 %v174_v50, %v103_v47  ;;  %v490_v50 = vld [vmem:[%s1226_s7 + $0x68] sm:$0xff] }
 0x11f   :  { %v177_v53 = vmax.f32 %v173_v49, 0.0  ;;  %v489_v49 = vld [vmem:[%s1226_s7 + $0x60] sm:$0xff] }
 0x120   :  { %v178_v52 = vmax.f32 %v175_v51, 0.0  ;;  %v826_v51 = vpack.c.bf16 %v490_v50, %v489_v49 }
 0x122   :  { %319 = vmatprep.mubr.f32.mxu1 %v178_v52  ;;  %v507_v52 = vld [vmem:[%s1226_s7 + $0xf0] sm:$0xff] }
 0x123   :  { %320 = vmatmul.mubr.f32.vlgmr.msra.gmra.mrb[0].mxu1 %v177_v53  ;;  %v508_v53 = vld [vmem:[%s1226_s7 + $0xf8] sm:$0xff] }
 0x124   :  { %803 = vmatpush3.bf16.msra.mxu1 %v802_v6  ;;  %v828_v54 = vpack.c.bf16 %v508_v53, %v507_v52 }
 0x125   :  { %805 = vmatprep.subr.bf16.mxu1 %v804_v7 }
 0x128   :  { %807 = vmatpush3.bf16.msra.mxu1 %v806_v12 }
 0x129   :  { %809 = vmatprep.subr.bf16.mxu1 %v808_v13 }
 0x12c   :  { %811 = vmatpush3.bf16.msra.mxu1 %v810_v18 }
 0x12d   :  { %813 = vmatprep.subr.bf16.mxu1 %v812_v19 }
 0x130   :  { %815 = vmatpush3.bf16.msra.mxu1 %v814_v24 }
 0x131   :  { %817 = vmatprep.subr.bf16.mxu1 %v816_v25 }
 0x134   :  { %819 = vmatpush3.bf16.msra.mxu1 %v818_v30 }
 0x135   :  { %821 = vmatprep.subr.bf16.mxu1 %v820_v31 }
 0x138   :  { %823 = vmatpush3.bf16.msra.mxu1 %v822_v36 }
 0x139   :  { %825 = vmatprep.subr.bf16.mxu1 %v824_v37 }
 0x13c   :  { %827 = vmatpush3.bf16.msra.mxu1 %v826_v51 }
 0x13d   :  { %829 = vmatprep.subr.bf16.mxu1 %v828_v54 }
 0x140   :  { %831 = vmatpush3.bf16.msra.mxu1 %v830_v57 }
 0x1f6   :  { %v321_v41 = vpop.f32.mrb[0].mxu1 }
 0x1f7   :  { %v322_v42 = vadd.f32 %v321_v41, %v248_v39  ;;  %v323_v44 = vpop.f32.mrb[1].mxu1 }
 0x1f8   :  { %v324_v46 = vadd.f32 %v323_v44, %v252_v40 }
 0x1f9   :  { %v326_v48 = vmax.f32 %v322_v42, 0.0 }
 0x1fa   :  { %v327_v47 = vmax.f32 %v324_v46, 0.0 }
 0x1fc   :  { %468 = vmatprep.mubr.f32.mxu0 %v327_v47 }
 0x1fd   :  { %469 = vmatmul.mubr.f32.vlgmr.msra.gmra.mrb[2].mxu0 %v326_v48 }
 0x2d0   :  { %v470_v61 = vpop.f32.mrb[2].mxu0 }
 0x2d1   :  { %v471_v62 = vadd.f32 %v470_v61, %v397_v59  ;;  %v472_v63 = vpop.f32.mrb[3].mxu0 }
 0x2d2   :  { %v473_v0 = vadd.f32 %v472_v63, %v401_v60 }
 0x2d3   :  { %v475_v2 = vmax.f32 %v471_v62, 0.0 }
 0x2d4   :  { %v476_v1 = vmax.f32 %v473_v0, 0.0 }
 0x2d6   :  { %580 = vmatprep.mubr.f32.mxu1 %v476_v1 }
 0x2d7   :  { %581 = vmatmul.mubr.f32.vlgmr.msra.gmra.mrb[2].mxu1 %v475_v2 }
 0x3aa   :  { %v637_v3 = vpop.f32.mrb[2].mxu1 }
 0x3ab   :  { %v638_v5 = vpop.f32.mrb[3].mxu1 }
 0x3ac   :  { %v639_v6 = vadd.f32 %v638_v5, %v637_v3 }
 0x3ae   :  { %v583_v43 = vadd.f32 %v639_v6, %v604_v4 }
 0x3b0   :  { %587 = vst.msk [vmem:[#allocation7] sm:$0xff] %vm586_vm0, %v583_v43 }
 0x3b1   :  { %893 = shalt.err (!%p890_p6)
}
 0x3b2   :  { %s894_s28 = scalar_lea.hbm %s1228_s9, 128 }
 0x3b3   :  { %p895_p7 = scmp.ne.s32.totalorder %s1228_s9, %s894_s28  ;;  %p898_p8 = scmp.lt.u32.totalorder %s894_s28, %s1228_s9 }
 0x3b5   :  { %p900_p9 = pnand %p898_p8, %p895_p7 }
 0x3b7   :  { %903 = shalt.err (!%p900_p9)
}
 0x3b8   :  { %597 = dma.vmem_to_hbm [thread:$0]  %s595_s6, 128, %s1228_s9, [#allocation4]  }
 0x3b9   :  { %908 = dma.done.wait [#allocation4], 128  }
 0x3ba   :  { %909 = vsyncadd [#allocation4], 4294967168 }
 0x3bb   :  { %601 = vsyncpa [#allocation3], 1 }
 0x3bc   :  { %602 = vsyncpa [#allocation6], 1 }
 0x3bd   :  { %603 = vsyncpa [#allocation4], 1 }

</bundles_post_ra>
